<compile_context>
chip_gen: v7x
topology: tpu7x:2x2x1
jax: 0.10.0
libtpu: 0.0.40
codegen_flags: <defaults>
</compile_context>

<pallas_src>
import functools
import math

import numpy as np
import jax
import jax.numpy as jnp
from jax.experimental import pallas as pl
from jax.experimental.pallas import tpu as pltpu


def _rel_pos_enc_kernel(inv_freq_ref, phase_ref, o_ref, *, start, max_len, rows_per_block):
    """Write one (TR, D) row-tile of the sliced relative sinusoidal table.

    Local row r of this block corresponds to row (start + program_id(0)*TR + r) of the
    full (2*max_len - 1, D) table, whose relative-position value is max_len - 1 - row.
    Column c holds sin(pos * inv_freq[c] + phase[c]); phase[c] = (c % 2) * pi/2 turns
    odd columns into cos, so only one transcendental is issued per element.
    """
    tr = o_ref.shape[0]
    r0 = pl.program_id(0) * rows_per_block

    # Integer/pos work on (TR, 1) only; broadcast happens at the final multiply.
    row = jax.lax.broadcasted_iota(jnp.int32, (tr, 1), 0)
    pos = ((max_len - 1 - start) - (row + r0)).astype(jnp.float32)       # (TR, 1)

    angle = pos * inv_freq_ref[...] + phase_ref[...]                      # (TR, D)
    o_ref[...] = jnp.sin(angle).astype(o_ref.dtype)                       # 1 EUP op / elem


class RelativeSinusoidalPositionalEncodingPallas:
    """JAX/Pallas port of RelativeSinusoidalPositionalEncoding.forward.

    Returns the same (batch_size, R, dim_model) tensor as the PyTorch module's
    `R.repeat(batch_size, 1, 1)`; the table is produced once by the Pallas kernel and
    the batch dimension is a (free) broadcast.
    """

    _MAX_ROWS_PER_BLOCK = 512  # multiple of 8; keeps blocks small on v5e/v7x VMEM

    def __init__(self, max_len, dim_model, causal=False):
        assert dim_model % 2 == 0, "dim_model must be even (as in the PyTorch module)"
        self.max_len = max_len
        self.dim_model = dim_model
        self.causal = causal

        # Hoisted per-column constants (trace-time numpy; zero in-kernel EUP cost).
        col = np.arange(dim_model)
        self._inv_freq = np.power(10000.0, -2.0 * (col // 2) / dim_model).astype(np.float32)[None, :]
        self._phase = ((col % 2) * (math.pi / 2.0)).astype(np.float32)[None, :]

    def _window(self, seq_len, hidden_len):
        # Same static slice arithmetic as the torch module.
        if self.causal:
            if seq_len is not None:
                return self.max_len - seq_len - hidden_len, self.max_len
            return 0, self.max_len
        if seq_len is not None:
            return self.max_len - seq_len - hidden_len, self.max_len - 1 + seq_len
        return 0, 2 * self.max_len - 1

    def __call__(self, batch_size=1, seq_len=None, hidden_len=0):
        start, stop = self._window(seq_len, hidden_len)
        r_rows = stop - start
        d = self.dim_model

        # Tile R: single full-extent block when small (full-dim exemption from the
        # 8-row rule), otherwise multiple-of-8 blocks with a ragged final block.
        if r_rows <= self._MAX_ROWS_PER_BLOCK:
            tr = r_rows
        else:
            tr = self._MAX_ROWS_PER_BLOCK
        n_blocks = pl.cdiv(r_rows, tr)

        kernel = functools.partial(
            _rel_pos_enc_kernel,
            start=start,
            max_len=self.max_len,
            rows_per_block=tr,
        )

        table = pl.pallas_call(
            kernel,
            out_shape=jax.ShapeDtypeStruct((r_rows, d), jnp.float32),
            grid_spec=pltpu.PrefetchScalarGridSpec(
                num_scalar_prefetch=0,
                grid=(n_blocks,),
                in_specs=[
                    pl.BlockSpec((1, d), lambda r: (0, 0)),   # inv_freq
                    pl.BlockSpec((1, d), lambda r: (0, 0)),   # phase
                ],
                out_specs=pl.BlockSpec((tr, d), lambda r: (r, 0)),
            ),
            compiler_params=pltpu.CompilerParams(
                dimension_semantics=("parallel",),
            ),
        )(jnp.asarray(self._inv_freq), jnp.asarray(self._phase))

        # Batch "repeat" as a broadcast instead of recomputing/rewriting the table B times.
        return jnp.broadcast_to(table[None], (batch_size, r_rows, d))


def _reference(max_len, dim_model, causal, batch_size, seq_len, hidden_len):
    """Pure-JAX replica of the PyTorch RelativeSinusoidalPositionalEncoding.forward."""
    pos_left = jnp.arange(max_len - 1, 0, -1, dtype=jnp.float32)
    pos_right = jnp.arange(0, -max_len, -1, dtype=jnp.float32)
    pos = jnp.concatenate([pos_left, pos_right])[:, None]
    k = jnp.arange(0, dim_model // 2, dtype=jnp.float32)[None, :]
    angles = pos / 10000 ** (2 * k / dim_model)
    pe = jnp.zeros((2 * max_len - 1, dim_model), jnp.float32)
    pe = pe.at[:, 0::2].set(jnp.sin(angles))
    pe = pe.at[:, 1::2].set(jnp.cos(angles))
    if causal:
        tab = pe[:max_len] if seq_len is None else pe[max_len - seq_len - hidden_len:max_len]
    elif seq_len is not None:
        tab = pe[max_len - seq_len - hidden_len:max_len - 1 + seq_len]
    else:
        tab = pe
    return jnp.broadcast_to(tab[None], (batch_size,) + tab.shape)


if __name__ == "__main__":
    _ = jax.random.PRNGKey(0)  # module takes only config scalars; key kept for convention

    # Shapes consistent with StridedRelPosMultiHeadSelfAttention.forward:
    #   rel_pos_enc(batch_size, stride * Q.size(1), K.size(1) - stride * Q.size(1))
    max_pos_encoding = 16
    dim_model = 32
    batch_size = 2
    stride = 2
    seq_len = 8                     # padded K/V length (multiple of stride)
    strided_T = seq_len // stride   # Q.size(1) after Q[:, ::stride]

    configs = [
        # (causal, seq_len, hidden_len)
        (False, stride * strided_T, 0),   # the call made by the strided attention module
        (False, stride * strided_T, 4),   # with streaming hidden state
        (True, stride * strided_T, 4),    # causal variant
        (False, None, 0),                 # full table
    ]

    for causal, sl, hl in configs:
        enc = RelativeSinusoidalPositionalEncodingPallas(
            max_pos_encoding, dim_model, causal=causal)
        out = jax.block_until_ready(enc(batch_size=batch_size, seq_len=sl, hidden_len=hl))
        ref = _reference(max_pos_encoding, dim_model, causal, batch_size, sl, hl)
        assert out.shape == ref.shape, (causal, sl, hl, out.shape, ref.shape)
        assert jnp.allclose(out, ref, atol=1e-5, rtol=1e-5), (causal, sl, hl)

    print("KERNEL_OK")
</pallas_src>

<mosaic_0001>
module attributes {stable_mosaic.version = 11 : i64} {
  func.func @_rel_pos_enc_kernel(%arg0: i32, %arg1: memref<1x32xf32, #tpu.memory_space<vmem>>, %arg2: memref<1x32xf32, #tpu.memory_space<vmem>>, %arg3: memref<15x32xf32, #tpu.memory_space<vmem>>) attributes {dimension_semantics = [#tpu.dimension_semantics<parallel>], iteration_bounds = array<i64: 1>, scalar_prefetch = 0 : i64, scratch_operands = 0 : i64, tpu.core_type = #tpu.core_type<tc>, window_params = [{pipeline_mode = #tpu.pipeline_mode<synchronous>, transform_indices = @transform_0, window_bounds = array<i64: 1, 32>}, {pipeline_mode = #tpu.pipeline_mode<synchronous>, transform_indices = @transform_1, window_bounds = array<i64: 1, 32>}, {transform_indices = @transform_2, window_bounds = array<i64: 15, 32>}]} {
    %c15_i32 = arith.constant 15 : i32
    %0 = arith.muli %arg0, %c15_i32 : i32
    %1 = tpu.iota {dimensions = array<i32: 0>} : vector<15x1xi32>
    %2 = vector.broadcast %0 : i32 to vector<15x1xi32>
    %3 = arith.addi %1, %2 : vector<15x1xi32>
    %c7_i32 = arith.constant 7 : i32
    %4 = vector.broadcast %c7_i32 : i32 to vector<15x1xi32>
    %5 = arith.subi %4, %3 : vector<15x1xi32>
    %6 = arith.sitofp %5 : vector<15x1xi32> to vector<15x1xf32>
    %c0 = arith.constant 0 : index
    %c0_0 = arith.constant 0 : index
    %7 = vector.load %arg1[%c0, %c0_0] : memref<1x32xf32, #tpu.memory_space<vmem>>, vector<1x32xf32>
    %8 = vector.broadcast %6 : vector<15x1xf32> to vector<15x32xf32>
    %9 = vector.broadcast %7 : vector<1x32xf32> to vector<15x32xf32>
    %10 = arith.mulf %8, %9 : vector<15x32xf32>
    %c0_1 = arith.constant 0 : index
    %c0_2 = arith.constant 0 : index
    %11 = vector.load %arg2[%c0_1, %c0_2] : memref<1x32xf32, #tpu.memory_space<vmem>>, vector<1x32xf32>
    %12 = vector.broadcast %11 : vector<1x32xf32> to vector<15x32xf32>
    %13 = arith.addf %10, %12 : vector<15x32xf32>
    %14 = math.sin %13 : vector<15x32xf32>
    %c0_3 = arith.constant 0 : index
    %c0_4 = arith.constant 0 : index
    %15 = vector.load %arg3[%c0_3, %c0_4] : memref<15x32xf32, #tpu.memory_space<vmem>>, vector<15x32xf32>
    tpu.vector_store %arg3[%c0_3, %c0_4], %14 {strides = array<i32>} : memref<15x32xf32, #tpu.memory_space<vmem>>, vector<15x32xf32>,
    return
  }
  func.func @transform_0(%arg0: i32) -> (i32, i32) {
    %c0_i32 = arith.constant 0 : i32
    %c0_i32_0 = arith.constant 0 : i32
    %c0_i32_1 = arith.constant 0 : i32
    return %c0_i32, %c0_i32_0 : i32, i32
  }
  func.func @transform_1(%arg0: i32) -> (i32, i32) {
    %c0_i32 = arith.constant 0 : i32
    %c0_i32_0 = arith.constant 0 : i32
    %c0_i32_1 = arith.constant 0 : i32
    return %c0_i32, %c0_i32_0 : i32, i32
  }
  func.func @transform_2(%arg0: i32) -> (i32, i32) {
    %c0_i32 = arith.constant 0 : i32
    %c0_i32_0 = arith.constant 0 : i32
    return %arg0, %c0_i32 : i32, i32
  }
}

</mosaic_0001>

<bundles_post_ra>
// kernel: tpu_custom_call.1
= control target key start
LH: loop header
LB: loop body
LE: loop exit
PB: predicated region body
PF: predicated region fallthrough
CT: control target
= control target key end

     0   :  { %7 = vsyncpa [#allocation3], 0  ;;  %s494_s0 = inlined_call_operand.hbm [shape: f32[1,32], index: 0, kind: input, shape index: {}]   ;;  %s495_s1 = inlined_call_operand.vmem [shape: f32[1,32], index: 1, kind: input, shape index: {}]   ;;  %s496_s2 = inlined_call_operand.hbm [shape: f32[15,32], index: 2, kind: output, shape index: {}]  }
   0x1   :  { %8 = vsyncpa [#allocation4], 0  ;;  %s366_s9 = smov [#allocation2]   ;;  %s318_s13 = scalar_lea.hbm %s494_s0, 16 }
   0x2   :  { %s15_s10 = sshll.u32 %s366_s9, 4  ;;  %p319_p0 = scmp.ne.s32.totalorder %s494_s0, %s318_s13  ;;  %s16_s10 = int_to_ptr.vmem [resolvable:$true] %s15_s10 }
   0x3   :  { %p322_p1 = scmp.lt.u32.totalorder %s318_s13, %s494_s0 }
   0x5   :  { %p324_p2 = pnand %p322_p1, %p319_p0 }
   0x7   :  { %327 = shalt.err (!%p324_p2)
}
   0x8   :  { %s328_s18 = scalar_lea.vmem %s16_s10, 16  ;;  %s332_s19 = scalar_lea.vmem %s16_s10, 32 }
   0x9   :  { %p329_p3 = scmp.ne.s32.totalorder %s16_s10, %s328_s18  ;;  %p333_p4 = scmp.lt.s32.totalorder %s16_s10, %s16_s10 }
   0xa   :  { %p334_p5 = scmp.lt.s32.totalorder %s332_s19, %s328_s18 }
   0xc   :  { %p335_p6 = por %p334_p5, %p333_p4 }
   0xe   :  { %p336_p7 = pnand %p335_p6, %p329_p3 }
  0x10   :  { %339 = shalt.err (!%p336_p7)
}
  0x11   :  { %18 = dma.hbm_to_vmem [thread:$0]  %s494_s0, 16, %s16_s10, [#allocation3]  }
  0x12   :  { %362 = dma.done.wait [#allocation3], 16  }
  0x13   :  { %363 = vsyncadd [#allocation3], 4294967280  ;;  %v25_v0 = vlaneseq  ;;  %v282_v6 = vld [vmem:[#allocation2] ss:$0 sm:$0xff]  ;;  %v367_v32 = vmov 683565275  }
  0x14   :  { %v283_v7 = vld [vmem:[%s495_s1] ss:$0 sm:$0xff]  ;;  %v368_v34 = vmov 2475754826   ;;  %v369_v36 = vmov 2131351028  }
  0x15   :  { %v26_v1 = vshrl.u32 %v25_v0, 7  ;;  %v370_v38 = vmov 2102212464   ;;  %v371_v40 = vmov 920167782   ;;  %s373_s0 = smov [#allocation5]  }
  0x16   :  { %v372_v47 = vmov 1326507024   ;;  %s270_s1 = sshll.u32 %s373_s0, 4  ;;  %s271_s1 = int_to_ptr.vmem [resolvable:$true] %s270_s1 }
  0x17   :  { %v31_v2 = vsub.s32 7, %v26_v1  ;;  %v27_v3 = vadd.s32 8, %v26_v1  ;;  %s340_s24 = scalar_lea.vmem %s271_s1, 256  ;;  %p345_p9 = scmp.lt.s32.totalorder %s271_s1, %s271_s1 }
  0x18   :  { %p341_p8 = scmp.ne.s32.totalorder %s271_s1, %s340_s24  ;;  %p346_p10 = scmp.lt.s32.totalorder %s340_s24, %s340_s24 }
  0x19   :  { %v33_v4 = vcvt.s32.f32 %v31_v2  ;;  %v32_v5 = vsub.s32 7, %v27_v3 }
  0x1a   :  { %p347_p11 = por %p346_p10, %p345_p9 }
  0x1b   :  { %v42_v8 = vmul.f32 %v282_v6, %v33_v4  ;;  %v34_v9 = vcvt.s32.f32 %v32_v5 }
  0x1c   :  { %p348_p12 = pnand %p347_p11, %p341_p8 }
  0x1d   :  { %v406_v10 = vadd.f32 %v283_v7, %v42_v8  ;;  %v43_v11 = vmul.f32 %v282_v6, %v34_v9 }
  0x1f   :  { %v53_v12 = vand.u32 2147483647, %v406_v10  ;;  %v56_v13 = vand.u32 2139095040, %v406_v10  ;;  %v410_v14 = vadd.f32 %v283_v7, %v43_v11  ;;  %vm55_vm14 = vcmp.lt.s32.totalorder %v406_v10, 0 }
  0x21   :  { %v57_v15 = vshrl.u32 %v56_v13, 23  ;;  %v60_v16 = vand.u32 8388607, %v53_v12  ;;  %v157_v17 = vand.u32 2147483647, %v410_v14  ;;  %v160_v18 = vand.u32 2139095040, %v410_v14 }
  0x22   :  { %vm54_vm15 = vcmp.le.f32.partialorder %v53_v12, 0.7853982 }
  0x23   :  { %v284_v19 = vadd.s32 4294967169, %v57_v15  ;;  %v161_v20 = vshrl.u32 %v160_v18, 23  ;;  %v61_v22 = vor.u32 8388608, %v60_v16  ;;  %v418_v24 = vand.u32 8388607, %v157_v17 }
  0x25   :  { %v63_v21 = vadd.s32 1, %v284_v19  ;;  %v288_v23 = vadd.s32 4294967169, %v161_v20  ;;  %v420_v29 = vshll.u32 %v61_v22, 8  ;;  %v165_v30 = vor.u32 8388608, %v418_v24 }
  0x27   :  { %vm64_vm0 = vcmp.gt.s32.totalorder %v63_v21, 0  ;;  %v167_v26 = vadd.s32 1, %v288_v23 }
  0x28   :  { %v65_v25 = vsel %vm64_vm0, %v63_v21, 0  ;;  %vm159_vm0 = vcmp.lt.s32.totalorder %v410_v14, 0 }
  0x29   :  { %v66_v27 = vshrl.u32 %v65_v25, 5  ;;  %v67_v28 = vand.u32 31, %v65_v25  ;;  %vm168_vm1 = vcmp.gt.s32.totalorder %v167_v26, 0 }
  0x2a   :  { %v169_v52 = vsel %vm168_vm1, %v167_v26, 0  ;;  %vm471_vm1 = vcmp.le.f32.partialorder %v157_v17, 0.7853982 }
  0x2b   :  { %v68_v31 = vsub.s32 32, %v67_v28  ;;  %v70_v33 = vshll.u32 %v367_v32, %v67_v28  ;;  %v73_v35 = vshll.u32 %v368_v34, %v67_v28  ;;  %v76_v37 = vshll.u32 %v369_v36, %v67_v28 }
  0x2c   :  { %v79_v39 = vshll.u32 %v370_v38, %v67_v28  ;;  %v82_v41 = vshll.u32 %v371_v40, %v67_v28  ;;  %vm85_vm2 = vcmp.lt.s32.totalorder %v66_v27, 1  ;;  %vm86_vm3 = vcmp.lt.s32.totalorder %v66_v27, 2 }
  0x2d   :  { %v69_v42 = vshrl.u32 %v367_v32, %v68_v31  ;;  %v71_v43 = vshrl.u32 %v368_v34, %v68_v31  ;;  %v74_v44 = vshrl.u32 %v369_v36, %v68_v31  ;;  %v77_v45 = vshrl.u32 %v370_v38, %v68_v31 }
  0x2e   :  { %v80_v46 = vshrl.u32 %v371_v40, %v68_v31  ;;  %v83_v48 = vshrl.u32 %v372_v47, %v68_v31  ;;  %vm87_vm4 = vcmp.lt.s32.totalorder %v66_v27, 3  ;;  %vm88_vm5 = vcmp.lt.s32.totalorder %v66_v27, 4 }
  0x2f   :  { %v72_v49 = vor.u32 %v71_v43, %v70_v33  ;;  %v75_v50 = vor.u32 %v74_v44, %v73_v35  ;;  %v78_v51 = vor.u32 %v77_v45, %v76_v37  ;;  %v170_v55 = vshrl.u32 %v169_v52, 5 }
  0x30   :  { %v81_v53 = vor.u32 %v80_v46, %v79_v39  ;;  %v84_v54 = vor.u32 %v83_v48, %v82_v41  ;;  %v171_v56 = vand.u32 31, %v169_v52 }
  0x31   :  { %v89_v57 = vsel %vm85_vm2, %v69_v42, %v72_v49  ;;  %v90_v58 = vsel %vm88_vm5, %v78_v51, 2102212464  ;;  %v93_v59 = vsel %vm85_vm2, %v72_v49, %v75_v50  ;;  %v97_v60 = vsel %vm85_vm2, %v75_v50, %v78_v51 }
  0x32   :  { %v91_v61 = vsel %vm87_vm4, %v75_v50, %v90_v58  ;;  %v94_v62 = vsel %vm88_vm5, %v81_v53, 920167782  ;;  %v98_v63 = vsel %vm88_vm5, %v84_v54, 1326507024  ;;  %v172_v0 = vsub.s32 32, %v171_v56 }
  0x33   :  { %v92_v1 = vsel %vm86_vm3, %v89_v57, %v91_v61  ;;  %v95_v2 = vsel %vm87_vm4, %v78_v51, %v94_v62  ;;  %v99_v3 = vsel %vm87_vm4, %v81_v53, %v98_v63  ;;  %v174_v4 = vshll.u32 %v367_v32, %v171_v56 }
  0x34   :  { %v96_v5 = vsel %vm86_vm3, %v93_v59, %v95_v2  ;;  %v100_v6 = vsel %vm86_vm3, %v97_v60, %v99_v3  ;;  %v108_v7 = vmul.u32 %v420_v29, %v92_v1  ;;  %v173_v8 = vshrl.u32 %v367_v32, %v172_v0 }
  0x35   :  { %v435_v9 = vmul.u32.u64.low %v420_v29, %v100_v6  ;;  %v436_v11 = vmul.u32.u64.high %v420_v29, %v100_v6, %v435_v9  ;;  %v439_v13 = vmul.u32.u64.low %v420_v29, %v96_v5  ;;  %v440_v15 = vmul.u32.u64.high %v420_v29, %v96_v5, %v439_v13 }
  0x36   :  { %v175_v16 = vshrl.u32 %v368_v34, %v172_v0  ;;  %v177_v18 = vshll.u32 %v368_v34, %v171_v56  ;;  %v178_v19 = vshrl.u32 %v369_v36, %v172_v0  ;;  %v180_v20 = vshll.u32 %v369_v36, %v171_v56 }
  0x37   :  { %v181_v21 = vshrl.u32 %v370_v38, %v172_v0  ;;  %v183_v22 = vshll.u32 %v370_v38, %v171_v56  ;;  %v184_v23 = vshrl.u32 %v371_v40, %v172_v0  ;;  %v186_v25 = vshll.u32 %v371_v40, %v171_v56 }
  0x38   :  { %v176_v26 = vor.u32 %v175_v16, %v174_v4  ;;  %v179_v27 = vor.u32 %v178_v19, %v177_v18  ;;  %v187_v28 = vshrl.u32 %v372_v47, %v172_v0  ;;  %vm189_vm6 = vcmp.lt.s32.totalorder %v170_v55, 1 }
  0x39   :  { %vm110_vm7 = vc.u32 %v436_v11, %v439_v13  ;;  %v111_v31 = vadd.s32 1, %v440_v15  ;;  %v182_v32 = vor.u32 %v181_v21, %v180_v20  ;;  %v205_v29 = vshll.u32 %v165_v30, 8 }
  0x3a   :  { %v185_v33 = vor.u32 %v184_v23, %v183_v22  ;;  %v188_v34 = vor.u32 %v187_v28, %v186_v25  ;;  %vm190_vm8 = vcmp.lt.s32.totalorder %v170_v55, 2  ;;  %vm191_vm9 = vcmp.lt.s32.totalorder %v170_v55, 3 }
  0x3b   :  { %v112_v35 = vsel %vm110_vm7, %v111_v31, %v440_v15  ;;  %vm192_vm10 = vcmp.lt.s32.totalorder %v170_v55, 4  ;;  %v193_v36 = vsel %vm189_vm6, %v173_v8, %v176_v26  ;;  %v197_v37 = vsel %vm189_vm6, %v176_v26, %v179_v27 }
  0x3c   :  { %v113_v38 = vadd.s32 %v112_v35, %v108_v7  ;;  %v194_v39 = vsel %vm192_vm10, %v182_v32, 2102212464  ;;  %v198_v40 = vsel %vm192_vm10, %v185_v33, 920167782  ;;  %v201_v41 = vsel %vm189_vm6, %v179_v27, %v182_v32 }
  0x3d   :  { %v195_v42 = vsel %vm191_vm9, %v179_v27, %v194_v39  ;;  %v199_v43 = vsel %vm191_vm9, %v182_v32, %v198_v40  ;;  %v202_v24 = vsel %vm192_vm10, %v188_v34, 1326507024  ;;  %v109_v2 = vadd.s32 %v439_v13, %v436_v11 }
  0x3e   :  { %v114_v30 = vadd.s32 536870912, %v113_v38  ;;  %v200_v44 = vsel %vm190_vm8, %v197_v37, %v199_v43  ;;  %v203_v45 = vsel %vm191_vm9, %v185_v33, %v202_v24  ;;  %v196_v46 = vsel %vm190_vm8, %v193_v36, %v195_v42 }
  0x3f   :  { %v204_v47 = vsel %vm190_vm8, %v201_v41, %v203_v45  ;;  %v453_v48 = vmul.u32.u64.low %v205_v29, %v200_v44  ;;  %v454_v49 = vmul.u32.u64.high %v205_v29, %v200_v44, %v453_v48  ;;  %v212_v54 = vmul.u32 %v205_v29, %v196_v46 }
  0x40   :  { %v115_v50 = vshrl.u32 %v114_v30, 30  ;;  %v456_v51 = vmul.u32.u64.low %v205_v29, %v204_v47  ;;  %v457_v52 = vmul.u32.u64.high %v205_v29, %v204_v47, %v456_v51  ;;  %vm145_vm5 = vweird.f32 %v406_v10 }
  0x41   :  { %v215_v56 = vadd.s32 1, %v454_v49  ;;  %vm261_vm6 = vcmask 261120   ;;  %vm249_vm10 = vweird.f32 %v410_v14 }
  0x42   :  { %v116_v53 = vshll.u32 %v115_v50, 30  ;;  %vm214_vm11 = vc.u32 %v457_v52, %v453_v48  ;;  %v139_v26 = vsub.s32 4, %v115_v50  ;;  %v213_v11 = vadd.s32 %v453_v48, %v457_v52 }
  0x43   :  { %v216_v58 = vsel %vm214_vm11, %v215_v56, %v454_v49  ;;  %vm263_vm11 = vcmask 260096  }
  0x44   :  { %v117_v57 = vsub.s32 %v113_v38, %v116_v53  ;;  %v217_v60 = vadd.s32 %v216_v58, %v212_v54  ;;  %v140_v33 = vsel %vm55_vm14, %v139_v26, %v115_v50 }
  0x45   :  { %v142_v38 = vsel %vm54_vm15, 0, %v140_v33 }
  0x46   :  { %v119_v59 = vsub.s32 0, %v117_v57  ;;  %v218_v61 = vadd.s32 536870912, %v217_v60  ;;  %v146_v43 = vadd.s32 3, %v142_v38 }
  0x48   :  { %v285_v55 = vmin.u32 %v119_v59, %v117_v57  ;;  %v219_v63 = vshrl.u32 %v218_v61, 30  ;;  %v147_v45 = vand.u32 3, %v146_v43 }
  0x4a   :  { %v121_v62 = vclz %v285_v55  ;;  %v220_v1 = vshll.u32 %v219_v63, 30  ;;  %v243_v30 = vsub.s32 4, %v219_v63  ;;  %vm152_vm2 = vcmp.eq.s32.totalorder %v147_v45, 2 }
  0x4b   :  { %vm149_vm3 = vcmp.eq.s32.totalorder %v147_v45, 0  ;;  %vm148_vm4 = vcmp.lt.s32.totalorder %v147_v45, 2 }
  0x4c   :  { %v286_v0 = vadd.s32 4294967294, %v121_v62  ;;  %v221_v4 = vsub.s32 %v217_v60, %v220_v1  ;;  %v244_v47 = vsel %vm159_vm0, %v243_v30, %v219_v63 }
  0x4d   :  { %v246_v51 = vsel %vm471_vm1, 0, %v244_v47 }
  0x4e   :  { %vm287_vm12 = vcmp.lt.s32.totalorder %v286_v0, 0  ;;  %v223_v8 = vsub.s32 0, %v221_v4  ;;  %v250_v56 = vadd.s32 3, %v246_v51 }
  0x4f   :  { %v124_v3 = vsel %vm287_vm12, 0, %v286_v0 }
  0x50   :  { %v125_v5 = vsub.s32 32, %v124_v3  ;;  %v126_v6 = vshll.u32 %v117_v57, %v124_v3  ;;  %v129_v7 = vsub.s32 4294967266, %v124_v3  ;;  %v289_v16 = vmin.u32 %v223_v8, %v221_v4 }
  0x51   :  { %v251_v60 = vand.u32 3, %v250_v56 }
  0x52   :  { %v127_v9 = vshrl.u32 %v109_v2, %v125_v5  ;;  %v130_v15 = vadd.s32 127, %v129_v7  ;;  %v225_v20 = vclz %v289_v16 }
  0x53   :  { %vm256_vm7 = vcmp.eq.s32.totalorder %v251_v60, 2  ;;  %vm253_vm8 = vcmp.eq.s32.totalorder %v251_v60, 0  ;;  %vm252_vm9 = vcmp.lt.s32.totalorder %v251_v60, 2 }
  0x54   :  { %v128_v18 = vor.u32 %v127_v9, %v126_v6  ;;  %v131_v19 = vshll.u32 %v130_v15, 23  ;;  %v290_v23 = vadd.s32 4294967294, %v225_v20 }
  0x56   :  { %v132_v21 = vor.u32 4788187, %v131_v19  ;;  %v135_v22 = vcvt.s32.f32 %v128_v18  ;;  %vm291_vm13 = vcmp.lt.s32.totalorder %v290_v23, 0 }
  0x57   :  { %v228_v27 = vsel %vm291_vm13, 0, %v290_v23 }
  0x58   :  { %v133_v25 = vand.u32 2147483647, %v132_v21  ;;  %v229_v28 = vsub.s32 32, %v228_v27  ;;  %v230_v31 = vshll.u32 %v221_v4, %v228_v27  ;;  %v233_v32 = vsub.s32 4294967266, %v228_v27 }
  0x5a   :  { %v136_v13 = vmul.f32 %v135_v22, %v133_v25  ;;  %v231_v34 = vshrl.u32 %v213_v11, %v229_v28  ;;  %v234_v35 = vadd.s32 127, %v233_v32 }
  0x5c   :  { %v137_v29 = vxor.u32 2147483648, %v136_v13  ;;  %v232_v39 = vor.u32 %v231_v34, %v230_v31  ;;  %v235_v40 = vshll.u32 %v234_v35, 23 }
  0x5e   :  { %v138_v36 = vsel %vm55_vm14, %v137_v29, %v136_v13  ;;  %v236_v41 = vor.u32 4788187, %v235_v40  ;;  %v239_v42 = vcvt.s32.f32 %v232_v39 }
  0x5f   :  { %v141_v37 = vsel %vm54_vm15, %v406_v10, %v138_v36 }
  0x60   :  { %310 = vcosq.f32 %v141_v37  ;;  %v237_v24 = vand.u32 2147483647, %v236_v41 }
  0x61   :  { %312 = vsinq.f32 %v141_v37 }
  0x62   :  { %v240_v44 = vmul.f32 %v239_v42, %v237_v24 }
  0x64   :  { %v241_v46 = vxor.u32 2147483648, %v240_v44 }
  0x66   :  { %v242_v48 = vsel %vm159_vm0, %v241_v46, %v240_v44 }
  0x67   :  { %v245_v50 = vsel %vm471_vm1, %v410_v14, %v242_v48 }
  0x68   :  { %314 = vcosq.f32 %v245_v50 }
  0x69   :  { %316 = vsinq.f32 %v245_v50 }
  0x6a   :  { %v311_v49 = vpop.eup %310 }
  0x6b   :  { %v313_v52 = vpop.eup %312  ;;  %v153_v53 = vxor.u32 2147483648, %v311_v49 }
  0x6c   :  { %v150_v17 = vxor.u32 2147483648, %v313_v52 }
  0x6d   :  { %v154_v54 = vsel %vm152_vm2, %v153_v53, %v313_v52 }
  0x6e   :  { %v151_v57 = vsel %vm149_vm3, %v311_v49, %v150_v17 }
  0x6f   :  { %v155_v58 = vsel %vm148_vm4, %v151_v57, %v154_v54 }
  0x70   :  { %v156_v59 = vsel %vm145_vm5, nan, %v155_v58 }
  0x71   :  { %262 = vst.msk [vmem:[#allocation5] sm:$0xff] %vm261_vm6, %v156_v59 }
  0x72   :  { %v315_v55 = vpop.eup %314 }
  0x73   :  { %v317_v61 = vpop.eup %316  ;;  %v257_v62 = vxor.u32 2147483648, %v315_v55 }
  0x74   :  { %v254_v63 = vxor.u32 2147483648, %v317_v61 }
  0x75   :  { %v258_v10 = vsel %vm256_vm7, %v257_v62, %v317_v61 }
  0x76   :  { %v255_v0 = vsel %vm253_vm8, %v315_v55, %v254_v63 }
  0x77   :  { %v259_v1 = vsel %vm252_vm9, %v255_v0, %v258_v10 }
  0x78   :  { %v260_v2 = vsel %vm249_vm10, nan, %v259_v1 }
  0x79   :  { %264 = vst.msk [vmem:[#allocation5 + $0x8] sm:$0x7f] %vm263_vm11, %v260_v2 }
  0x7a   :  { %351 = shalt.err (!%p348_p12)
}
  0x7b   :  { %s352_s27 = scalar_lea.hbm %s496_s2, 256 }
  0x7c   :  { %p353_p13 = scmp.ne.s32.totalorder %s496_s2, %s352_s27  ;;  %p356_p0 = scmp.lt.u32.totalorder %s352_s27, %s496_s2 }
  0x7e   :  { %p358_p1 = pnand %p356_p0, %p353_p13 }
  0x80   :  { %361 = shalt.err (!%p358_p1)
}
  0x81   :  { %s374_s4 = smov 128   ;;  %s375_s5 = smov 8  }
  0x82   :  { %276 = dma.vmem_to_hbm [thread:$0]  %s271_s1, 256, %s496_s2, [#allocation4], %s374_s4, %s374_s4, %s375_s5  }
  0x83   :  { %364 = dma.done.wait [#allocation4], 256  }
  0x84   :  { %365 = vsyncadd [#allocation4], 4294967040 }
  0x85   :  { %280 = vsyncpa [#allocation3], 1 }
  0x86   :  { %281 = vsyncpa [#allocation4], 1 }

</bundles_post_ra>
